<compile_context>
chip_gen: v5e
topology: v5e:2x2
jax: 0.10.0
libtpu: 0.0.40
codegen_flags: <defaults>
</compile_context>

<pallas_src>
import jax
import jax.numpy as jnp
from jax.experimental import pallas as pl
from jax.experimental.pallas import tpu as pltpu


def _add_per_molecule_kernel(starts_ref, prop_ref, idx_ref, vals_ref, out_ref):
    """One block of atoms: out = concat(prop, vals[idx][:, None]) in one store."""
    w = vals_ref.shape[-1]

    start = starts_ref[pl.program_id(0)]          # SMEM scalar: first molecule id in block
    prop = prop_ref[...]                          # [ta, F]
    idx = idx_ref[...]                            # [ta, 1] int32 (molecule id per atom)
    vals = vals_ref[0]                            # [1, W]  float32 value window

    # one-hot gather against the per-block molecule-id window
    win_ids = start + jax.lax.broadcasted_iota(jnp.int32, (1, w), 1)      # [1, W]
    sel = jnp.where(idx == win_ids, vals, jnp.float32(0.0))               # [ta, W]
    expanded = jnp.sum(sel, axis=-1, keepdims=True)                       # [ta, 1]

    # single unmasked-as-possible full-block store (no partial column writes)
    out_ref[...] = jnp.concatenate(
        [prop, expanded.astype(prop.dtype)], axis=-1
    ).astype(out_ref.dtype)


def add_per_molecule_value(
    per_atom_property: jax.Array,         # [n_atoms, F]
    per_molecule_values: jax.Array,       # [n_molecules]
    atomic_subsystem_indices: jax.Array,  # [n_atoms] int, sorted / molecule-contiguous
    *,
    block_atoms: int = 1024,
    vmem_budget_bytes: int = 8 * 2**20,   # conservative: fits v5e 16 MiB scoped default
    assume_sorted: bool = True,
) -> jax.Array:
    """Returns [n_atoms, F+1] = concat(per_atom_property, values[indices][:, None])."""
    n_atoms, n_feat = per_atom_property.shape
    n_mol = int(per_molecule_values.shape[0])
    dtype = per_atom_property.dtype
    itemsize = jnp.dtype(dtype).itemsize

    # dtype-aware sublane alignment: 8 (f32) / 16 (bf16) / 32 (int8, fp8)
    sub = 8 * max(1, 4 // itemsize)
    lane = 128

    # --- derive the atom tile size from a VMEM budget (padded-lane accounting) ---
    if n_atoms <= block_atoms:
        ta = n_atoms                      # single block: full extent, layout-exempt
    else:
        ta = max(sub, (block_atoms // sub) * sub)
        fp = ((n_feat + lane - 1) // lane) * lane
        f1p = ((n_feat + 1 + lane - 1) // lane) * lane

        def _vmem_bytes(t):
            w = min(t, n_mol) if assume_sorted else n_mol
            blocks = t * (fp + f1p) * itemsize + t * lane * 4   # prop + out + idx tiles
            return 2 * blocks + t * w * 4 + 2 * w * 4           # dbl-buffer + one-hot tmp

        while ta > sub and _vmem_bytes(ta) > vmem_budget_bytes:
            ta = max(sub, ((ta // 2) // sub) * sub)

    n_blocks = -(-n_atoms // ta)

    idx_i32 = atomic_subsystem_indices.astype(jnp.int32)
    idx2d = idx_i32.reshape(n_atoms, 1)
    vals_f32 = per_molecule_values.astype(jnp.float32)

    # --- per-block molecule-value windows (bounded one-hot gather) ---
    wwin = min(ta, n_mol) if assume_sorted else n_mol
    if wwin >= n_mol:
        # whole value vector fits in one shared, resident window
        wwin = n_mol
        starts = jnp.zeros((n_blocks,), jnp.int32)
        vals_win = vals_f32.reshape(1, 1, n_mol)
        vals_map = lambda i, s: (0, 0, 0)
    else:
        # sorted indices => molecule ids inside a ta-atom block span < ta values,
        # so a window of wwin = ta values starting at the block's first id covers it.
        block_first = jnp.arange(n_blocks, dtype=jnp.int32) * ta
        starts = idx_i32[block_first]
        win_idx = jnp.clip(
            starts[:, None] + jnp.arange(wwin, dtype=jnp.int32)[None, :], 0, n_mol - 1
        )
        vals_win = vals_f32[win_idx].reshape(n_blocks, 1, wwin)
        vals_map = lambda i, s: (i, 0, 0)

    cost = pl.CostEstimate(
        flops=3 * n_atoms * wwin,         # compare + select + reduce per (atom, window slot)
        transcendentals=0,
        bytes_accessed=(n_atoms * n_feat + n_atoms * (n_feat + 1)) * itemsize
        + n_atoms * 4 + vals_win.size * 4 + n_blocks * 4,
    )

    # NOTE: the ragged last block relies on Pallas masking the out-of-bounds rows of
    # the output writeback (garbage rows computed from stale VMEM are never stored).
    return pl.pallas_call(
        _add_per_molecule_kernel,
        out_shape=jax.ShapeDtypeStruct((n_atoms, n_feat + 1), dtype),
        grid_spec=pltpu.PrefetchScalarGridSpec(
            num_scalar_prefetch=1,                      # per-block window starts -> SMEM
            grid=(n_blocks,),
            in_specs=[
                pl.BlockSpec((ta, n_feat), lambda i, s: (i, 0)),      # per-atom properties
                pl.BlockSpec((ta, 1), lambda i, s: (i, 0)),           # molecule id per atom
                pl.BlockSpec((1, 1, wwin), vals_map),                 # value window
            ],
            out_specs=pl.BlockSpec((ta, n_feat + 1), lambda i, s: (i, 0)),
        ),
        compiler_params=pltpu.CompilerParams(
            dimension_semantics=("parallel",),
        ),
        cost_estimate=cost,
    )(starts, per_atom_property, idx2d, vals_win)


if __name__ == "__main__":
    key = jax.random.PRNGKey(0)
    k1, k2, k3 = jax.random.split(key, 3)

    # Case 1: 4 molecules with 3/5/4/8 atoms -> 20 atoms, 8 per-atom features.
    counts = jnp.array([3, 5, 4, 8], dtype=jnp.int32)
    n_mol = int(counts.shape[0])
    n_atoms = int(counts.sum())
    n_feat = 8

    per_atom = jax.random.normal(k1, (n_atoms, n_feat), dtype=jnp.float32)
    per_mol = jax.random.normal(k2, (n_mol,), dtype=jnp.float32)
    subsystem_idx = jnp.repeat(
        jnp.arange(n_mol, dtype=jnp.int32), counts, total_repeat_length=n_atoms
    )

    out = jax.block_until_ready(
        add_per_molecule_value(per_atom, per_mol, subsystem_idx)
    )
    # Reference: for sorted/contiguous indices repeat_interleave(values, counts)
    # is exactly values[indices].
    ref = jnp.concatenate([per_atom, per_mol[subsystem_idx][:, None]], axis=1)
    assert out.shape == (n_atoms, n_feat + 1) and out.dtype == per_atom.dtype
    assert jnp.allclose(out, ref, atol=1e-6, rtol=1e-6)

    # Case 2: multi-block ragged grid AND the windowed-gather path (n_mol > block).
    n_mol2, n_atoms2 = 10, 20
    counts2 = jnp.full((n_mol2,), 2, dtype=jnp.int32)
    per_atom2 = jax.random.normal(k3, (n_atoms2, n_feat), dtype=jnp.float32)
    per_mol2 = jnp.arange(n_mol2, dtype=jnp.float32) * 0.5 - 2.0
    idx2 = jnp.repeat(
        jnp.arange(n_mol2, dtype=jnp.int32), counts2, total_repeat_length=n_atoms2
    )
    out2 = jax.block_until_ready(
        add_per_molecule_value(per_atom2, per_mol2, idx2, block_atoms=8)
    )
    ref2 = jnp.concatenate([per_atom2, per_mol2[idx2][:, None]], axis=1)
    assert jnp.allclose(out2, ref2, atol=1e-6, rtol=1e-6)

    print("KERNEL_OK")
</pallas_src>

<mosaic_0001>
module attributes {stable_mosaic.version = 11 : i64} {
  func.func @_add_per_molecule_kernel(%arg0: i32, %arg1: memref<1xi32, #tpu.memory_space<smem>>, %arg2: memref<20x8xf32, #tpu.memory_space<vmem>>, %arg3: memref<20x1xi32, #tpu.memory_space<vmem>>, %arg4: memref<1x1x4xf32, #tpu.memory_space<vmem>>, %arg5: memref<20x9xf32, #tpu.memory_space<vmem>>) attributes {dimension_semantics = [#tpu.dimension_semantics<parallel>], iteration_bounds = array<i64: 1>, scalar_prefetch = 1 : i64, scratch_operands = 0 : i64, tpu.core_type = #tpu.core_type<tc>, window_params = [{transform_indices = @transform_0, window_bounds = array<i64: 20, 8>}, {transform_indices = @transform_1, window_bounds = array<i64: 20, 1>}, {pipeline_mode = #tpu.pipeline_mode<synchronous>, transform_indices = @transform_2, window_bounds = array<i64: 1, 1, 4>}, {transform_indices = @transform_3, window_bounds = array<i64: 20, 9>}]} {
    %0 = arith.index_cast %arg0 : i32 to index
    %1 = memref.load %arg1[%0] : memref<1xi32, #tpu.memory_space<smem>>
    %c0 = arith.constant 0 : index
    %c0_0 = arith.constant 0 : index
    %2 = vector.load %arg2[%c0, %c0_0] : memref<20x8xf32, #tpu.memory_space<vmem>>, vector<20x8xf32>
    %c0_1 = arith.constant 0 : index
    %c0_2 = arith.constant 0 : index
    %3 = vector.load %arg3[%c0_1, %c0_2] : memref<20x1xi32, #tpu.memory_space<vmem>>, vector<20x1xi32>
    %c0_3 = arith.constant 0 : index
    %c0_4 = arith.constant 0 : index
    %c0_5 = arith.constant 0 : index
    %4 = vector.load %arg4[%c0_3, %c0_4, %c0_5] : memref<1x1x4xf32, #tpu.memory_space<vmem>>, vector<1x1x4xf32>
    %5 = vector.shape_cast %4 : vector<1x1x4xf32> to vector<1x4xf32>
    %6 = tpu.iota {dimensions = array<i32: 1>} : vector<1x4xi32>
    %7 = vector.broadcast %1 : i32 to vector<1x4xi32>
    %8 = arith.addi %7, %6 : vector<1x4xi32>
    %9 = vector.broadcast %3 : vector<20x1xi32> to vector<20x4xi32>
    %10 = vector.broadcast %8 : vector<1x4xi32> to vector<20x4xi32>
    %11 = arith.cmpi eq, %9, %10 : vector<20x4xi32>
    %cst = arith.constant 0.000000e+00 : f32
    %12 = vector.shape_cast %5 : vector<1x4xf32> to vector<1x4xf32>
    %13 = vector.broadcast %12 : vector<1x4xf32> to vector<20x4xf32>
    %14 = vector.broadcast %cst : f32 to vector<20x4xf32>
    %15 = arith.select %11, %13, %14 : vector<20x4xi1>, vector<20x4xf32>
    %cst_6 = arith.constant dense<0.000000e+00> : vector<20xf32>
    %16 = vector.multi_reduction <add>, %15, %cst_6 [1] : vector<20x4xf32> to vector<20xf32>
    %17 = vector.shape_cast %16 : vector<20xf32> to vector<20x1xf32>
    %18 = tpu.concatenate %2, %17 in 1 : vector<20x8xf32>, vector<20x1xf32> -> vector<20x9xf32>
    %c0_7 = arith.constant 0 : index
    %c0_8 = arith.constant 0 : index
    %19 = vector.load %arg5[%c0_7, %c0_8] : memref<20x9xf32, #tpu.memory_space<vmem>>, vector<20x9xf32>
    tpu.vector_store %arg5[%c0_7, %c0_8], %18 {strides = array<i32>} : memref<20x9xf32, #tpu.memory_space<vmem>>, vector<20x9xf32>,
    return
  }
  func.func @transform_0(%arg0: i32, %arg1: memref<1xi32, #tpu.memory_space<smem>>) -> (i32, i32) {
    %c0_i32 = arith.constant 0 : i32
    %c0_i32_0 = arith.constant 0 : i32
    return %arg0, %c0_i32 : i32, i32
  }
  func.func @transform_1(%arg0: i32, %arg1: memref<1xi32, #tpu.memory_space<smem>>) -> (i32, i32) {
    %c0_i32 = arith.constant 0 : i32
    %c0_i32_0 = arith.constant 0 : i32
    return %arg0, %c0_i32 : i32, i32
  }
  func.func @transform_2(%arg0: i32, %arg1: memref<1xi32, #tpu.memory_space<smem>>) -> (i32, i32, i32) {
    %c0_i32 = arith.constant 0 : i32
    %c0_i32_0 = arith.constant 0 : i32
    %c0_i32_1 = arith.constant 0 : i32
    %c0_i32_2 = arith.constant 0 : i32
    return %c0_i32, %c0_i32_0, %c0_i32_1 : i32, i32, i32
  }
  func.func @transform_3(%arg0: i32, %arg1: memref<1xi32, #tpu.memory_space<smem>>) -> (i32, i32) {
    %c0_i32 = arith.constant 0 : i32
    %c0_i32_0 = arith.constant 0 : i32
    return %arg0, %c0_i32 : i32, i32
  }
}

</mosaic_0001>

<bundles_post_ra>
// kernel: tpu_custom_call.1
= control target key start
LH: loop header
LB: loop body
LE: loop exit
PB: predicated region body
PF: predicated region fallthrough
CT: control target
= control target key end

     0   :  { %v74_v0 = vmov 0   ;;  %v24_v4 = vlaneseq  ;;  %vm46_vm0 = vcmask 31744   ;;  %vm53_vm4 = vcmask 27648   ;;  %s133_s2 = inlined_call_operand.vmem [shape: s32[20,1], index: 2, kind: input, shape index: {}]   ;;  %s134_s3 = inlined_call_operand.vmem [shape: f32[1,1,4], index: 3, kind: input, shape index: {}]   ;;  %s135_s0 = inlined_call_operand.<no memory space> [shape: s32[1], index: 0, kind: input, shape index: {}]   ;;  %s136_s1 = inlined_call_operand.vmem [shape: f32[20,8], index: 1, kind: input, shape index: {}]   ;;  %s137_s4 = inlined_call_operand.vmem [shape: f32[20,9], index: 4, kind: output, shape index: {}]  }
   0x1   :  { %71 = vset.pattern.permute.xlu0 %v74_v0  ;;  %v20_v1 = vld [vmem:[%s133_s2] sm:$0xff]  ;;  %72 = vset.pattern.permute.xlu1 %v74_v0  ;;  %v22_v2 = vld [vmem:[%s133_s2 + $0x10] sm:$0xf]  ;;  %v21_v3 = vld [vmem:[%s133_s2 + $0x8] sm:$0xff]  ;;  %v26_v6 = vstv %s135_s0  ;;  %vm57_vm5 = vcmask 64512   ;;  %vm61_vm6 = vcmask 72704  }
   0x2   :  { %29 = vperm.xlu0 %71, %v20_v1   ;;  %35 = vperm.xlu1 %72, %v22_v2   ;;  %v25_v5 = vand.u32 127, %v24_v4  ;;  %v73_v8 = vld [vmem:[%s134_s3] ss:$0 sm:$0xff]  ;;  %v18_v21 = vld [vmem:[%s136_s1 + $0x8] sm:$0xff]  ;;  %v19_v24 = vld [vmem:[%s136_s1 + $0x10] sm:$0xf] }
   0x3   :  { %v17_v18 = vld [vmem:[%s136_s1] sm:$0xff]  ;;  %vm64_vm7 = vcmask 68608  }
   0x4   :  { %v27_v7 = vadd.s32 %v26_v6, %v25_v5 }
   0xa   :  { %32 = vperm.xlu0 %71, %v21_v3  }
  0x74   :  { %v30_v9 = vpop.permute.xlu0 %29  ;;  %v36_v13 = vpop.permute.xlu1 %35 }
  0x75   :  { %vm37_vm1 = vcmp.eq.s32.totalorder %v30_v9, %v27_v7  ;;  %vm39_vm3 = vcmp.eq.s32.totalorder %v36_v13, %v27_v7 }
  0x76   :  { %v43_v10 = vsel %vm37_vm1, %v73_v8, 0.0  ;;  %v45_v16 = vsel %vm39_vm3, %v73_v8, 0.0 }
  0x77   :  { %v47_v11 = vsel %vm46_vm0, %v43_v10, 0.0  ;;  %v54_v17 = vsel %vm53_vm4, %v45_v16, 0.0 }
  0x78   :  { %48 = vadd.xlane.f32.xlu1 %v47_v11 }
  0x7c   :  { %v33_v12 = vpop.permute.xlu0 %32 }
  0x7d   :  { %vm38_vm2 = vcmp.eq.s32.totalorder %v33_v12, %v27_v7 }
  0x7e   :  { %v44_v14 = vsel %vm38_vm2, %v73_v8, 0.0 }
  0x7f   :  { %v50_v15 = vsel %vm46_vm0, %v44_v14, 0.0 }
  0x80   :  { %51 = vadd.xlane.f32.xlu2 %v50_v15 }
  0x88   :  { %55 = vadd.xlane.f32.xlu2 %v54_v17 }
  0xeb   :  { %v49_v19 = vpop.xlane.xlu1 %48 }
  0xec   :  { %v58_v20 = vsel %vm57_vm5, %v17_v18, %v49_v19 }
  0xed   :  { %62 = vst.msk [vmem:[%s137_s4] sm:$0xff] %vm61_vm6, %v58_v20 }
  0xf3   :  { %v52_v22 = vpop.xlane.xlu2 %51 }
  0xf4   :  { %v59_v23 = vsel %vm57_vm5, %v18_v21, %v52_v22 }
  0xf5   :  { %63 = vst.msk [vmem:[%s137_s4 + $0x8] sm:$0xff] %vm61_vm6, %v59_v23 }
  0xfb   :  { %v56_v25 = vpop.xlane.xlu2 %55 }
  0xfc   :  { %v60_v26 = vsel %vm57_vm5, %v19_v24, %v56_v25 }
  0xfd   :  { %65 = vst.msk [vmem:[%s137_s4 + $0x10] sm:$0xf] %vm64_vm7, %v60_v26 }

</bundles_post_ra>
